<compile_context>
chip_gen: v7x
topology: tpu7x:2x2x1
jax: 0.10.0
libtpu: 0.0.40
codegen_flags: <defaults>
</compile_context>

<pallas_src>
import time
from functools import partial

import jax
import jax.numpy as jnp
from jax.experimental import pallas as pl
from jax.experimental.pallas import tpu as pltpu

# Lane widths tried largest-first; payload length must be an exact multiple so
# the kernel never needs padding or a masked tail block.
_LANE_CANDIDATES = (4096, 2048, 1024, 512, 256, 128)


def _reconstruct_kernel(x_ref, o_ref):
    # Identity "decode/reconstruction" of the received semantic representation.
    # TODO(synk): concrete BaseReceiver subclasses insert real decoder compute here.
    o_ref[...] = x_ref[...]


def _target_block_bytes() -> int:
    """Per-generation block-size target for the streaming copy."""
    try:
        info = pltpu.get_tpu_info()
        vmem = int(getattr(info, "vmem_capacity_bytes", 128 << 20))
    except Exception:  # pragma: no cover - conservative fallback off-TPU
        vmem = 128 << 20
    # v7x: 64 MiB VMEM/TC but ~3.2 TB/s HBM -> 8 MiB blocks amortize the fixed
    # ~0.35us/grid-step overhead (4 x 8 = 32 MiB double-buffered, >=32 MiB
    # headroom).  v5e/v6e: 128 MiB VMEM, lower HBM BW -> 4 MiB already sits on
    # the bandwidth plateau and keeps the derived limit well under v5e's
    # default scoped VMEM behaviour.
    return (8 << 20) if vmem <= (64 << 20) else (4 << 20)


def _choose_tiling(n: int, itemsize: int, target_block_bytes: int):
    """Return (lane, rows, block_rows) for a clean (no-padding) tiling, or None."""
    packing = max(1, 4 // itemsize)      # sublane packing: f32->1, bf16->2, int8->4
    row_align = 8 * packing              # keep vregs fully packed
    lane = next((l for l in _LANE_CANDIDATES if n % l == 0), None)
    if lane is None:
        return None
    rows = n // lane
    if n * itemsize <= target_block_bytes:
        # Single block equal to the full array: always a legal BlockSpec.
        return lane, rows, rows
    if rows % row_align != 0:
        return None
    max_rows = max(row_align,
                   (target_block_bytes // (lane * itemsize)) // row_align * row_align)
    block_rows = None
    b = max_rows
    while b >= row_align:
        if rows % b == 0:
            block_rows = b
            break
        b -= row_align
    if block_rows is None:
        return None
    return lane, rows, block_rows


def _pallas_copy_2d(x2d: jax.Array, block_rows: int, vmem_limit_bytes: int) -> jax.Array:
    rows, lane = x2d.shape
    grid = (rows // block_rows,)
    return pl.pallas_call(
        _reconstruct_kernel,
        out_shape=jax.ShapeDtypeStruct((rows, lane), x2d.dtype),
        grid=grid,
        in_specs=[pl.BlockSpec((block_rows, lane), lambda i: (i, 0))],
        out_specs=pl.BlockSpec((block_rows, lane), lambda i: (i, 0)),
        # Identity pass: alias input buffer to output -> no second HBM buffer.
        input_output_aliases={0: 0},
        compiler_params=pltpu.CompilerParams(
            # TODO(synk): on v7x, verify 2-TC sharding; fall back to an explicit
            # CORE_PARALLEL leading axis if "parallel" alone does not split.
            dimension_semantics=("parallel",),
            vmem_limit_bytes=vmem_limit_bytes,
        ),
    )(x2d)


def _reconstruct_impl(x: jax.Array) -> jax.Array:
    n = x.size
    if n == 0:
        return x
    tiling = _choose_tiling(n, x.dtype.itemsize, _target_block_bytes())
    if tiling is None:
        # No clean lane-dense tiling without padding.  Base-class reconstruction
        # is the identity, so skip the pad->copy->slice HBM round trips entirely.
        # TODO(synk): subclasses with real decode compute should mask the ragged
        # tail block in-kernel (pl.when + pltpu.store mask) instead of bailing.
        return x
    lane, rows, block_rows = tiling
    block_bytes = block_rows * lane * x.dtype.itemsize
    vmem_limit = 4 * block_bytes + (4 << 20)   # in+out double-buffered + headroom
    out2d = _pallas_copy_2d(x.reshape(rows, lane), block_rows, vmem_limit)
    return out2d.reshape(x.shape)


@partial(jax.jit, donate_argnums=(0,))
def _reconstruct_donated(x: jax.Array) -> jax.Array:
    return _reconstruct_impl(x)


@jax.jit
def _reconstruct(x: jax.Array) -> jax.Array:
    return _reconstruct_impl(x)


class BaseReceiverPallas:
    """Concrete Pallas-backed receiver matching BaseReceiver's interface.

    config options:
      donate_input (bool, default True): donate the device buffer to the kernel
        path so the identity reconstruction needs no extra HBM allocation.
        Callers must not reuse `received_data` after forward() when enabled.
      force_kernel (bool, default False): run the Pallas copy kernel even though
        the base-class reconstruction is the identity (used by subclasses /
        tests that want the decode stage exercised on-device).
    """

    def __init__(self, config: dict | None = None):
        self.config = config if config is not None else {}
        # No learnable parameters: the abstract base class __init__ defines none.
        self._donate = bool(self.config.get("donate_input", True))
        self._force_kernel = bool(self.config.get("force_kernel", False))

    def get_config(self) -> dict:
        return self.config

    def forward(self, received_data: jax.Array):
        t0 = time.perf_counter()
        # BaseReceiver defines no concrete decode stage; "decoding" is a no-op
        # pass-through of the received semantic representation.
        decoded = jax.block_until_ready(received_data)
        t1 = time.perf_counter()

        if self._force_kernel:
            fn = _reconstruct_donated if self._donate else _reconstruct
            reconstructed = fn(decoded)
        else:
            # Identity fast path: skip the Pallas kernel entirely -- the bytes
            # are already correct in place, so moving them HBM->VMEM->HBM would
            # be pure overhead for the base-class receiver.
            reconstructed = decoded
        reconstructed = jax.block_until_ready(reconstructed)
        t2 = time.perf_counter()

        timings = {
            "decoding_time": t1 - t0,
            "reconstruction_time": t2 - t1,
        }
        return reconstructed, timings


if __name__ == "__main__":
    key = jax.random.PRNGKey(0)
    # Small NCHW "received semantic representation": batch=2, channels=4, 16x16.
    x = jax.random.normal(key, (2, 4, 16, 16), dtype=jnp.float32)
    x_host = jax.device_get(x)  # host copy: the kernel path donates its input

    # Receiver that exercises the Pallas copy kernel (what a concrete subclass's
    # decode stage would look like).
    receiver = BaseReceiverPallas(
        config={"name": "identity_receiver", "force_kernel": True})

    # Warm up compilation on a same-shape dummy so the timed call below
    # measures the kernel, not tracing/compilation.
    warm = jnp.zeros(x_host.shape, dtype=x_host.dtype)
    jax.block_until_ready(receiver.forward(warm)[0])

    y, timings = receiver.forward(x)  # x is donated on the kernel path
    y = jax.block_until_ready(y)

    assert y.shape == tuple(x_host.shape) and y.dtype == x_host.dtype
    assert bool(jnp.allclose(y, jnp.asarray(x_host)))
    assert set(timings.keys()) == {"decoding_time", "reconstruction_time"}

    # Default receiver: identity fast path (no kernel, no HBM traffic).
    fast = BaseReceiverPallas(config={"name": "identity_receiver"})
    y_fast, t_fast = fast.forward(jnp.asarray(x_host))
    assert bool(jnp.allclose(jax.block_until_ready(y_fast), jnp.asarray(x_host)))
    assert set(t_fast.keys()) == {"decoding_time", "reconstruction_time"}

    assert receiver.get_config()["name"] == "identity_receiver"
    print("KERNEL_OK")
</pallas_src>

<mosaic_0001>
module attributes {stable_mosaic.version = 11 : i64} {
  func.func @_reconstruct_kernel(%arg0: i32, %arg1: memref<1x2048xf32, #tpu.memory_space<vmem>>, %arg2: memref<1x2048xf32, #tpu.memory_space<vmem>>) attributes {dimension_semantics = [#tpu.dimension_semantics<parallel>], iteration_bounds = array<i64: 1>, scalar_prefetch = 0 : i64, scratch_operands = 0 : i64, tpu.core_type = #tpu.core_type<tc>, window_params = [{transform_indices = @transform_0, window_bounds = array<i64: 1, 2048>}, {transform_indices = @transform_1, window_bounds = array<i64: 1, 2048>}]} {
    %c0 = arith.constant 0 : index
    %c0_0 = arith.constant 0 : index
    %0 = vector.load %arg1[%c0, %c0_0] : memref<1x2048xf32, #tpu.memory_space<vmem>>, vector<1x2048xf32>
    %c0_1 = arith.constant 0 : index
    %c0_2 = arith.constant 0 : index
    %1 = vector.load %arg2[%c0_1, %c0_2] : memref<1x2048xf32, #tpu.memory_space<vmem>>, vector<1x2048xf32>
    tpu.vector_store %arg2[%c0_1, %c0_2], %0 {strides = array<i32>} : memref<1x2048xf32, #tpu.memory_space<vmem>>, vector<1x2048xf32>,
    return
  }
  func.func @transform_0(%arg0: i32) -> (i32, i32) {
    %c0_i32 = arith.constant 0 : i32
    %c0_i32_0 = arith.constant 0 : i32
    return %arg0, %c0_i32 : i32, i32
  }
  func.func @transform_1(%arg0: i32) -> (i32, i32) {
    %c0_i32 = arith.constant 0 : i32
    %c0_i32_0 = arith.constant 0 : i32
    return %arg0, %c0_i32 : i32, i32
  }
}

</mosaic_0001>

<bundles_post_ra>
// kernel: _reconstruct_donated.1
= control target key start
LH: loop header
LB: loop body
LE: loop exit
PB: predicated region body
PF: predicated region fallthrough
CT: control target
= control target key end

     0   :  { %s38_s0 = inlined_call_operand.vmem [shape: f32[1,2048], index: 0, kind: input, shape index: {}, may-alias: {0,1}]   ;;  %s39_s1 = inlined_call_operand.vmem [shape: f32[1,2048], index: 1, kind: output, shape index: {}, may-alias: {0,1}]  }
   0x1   :  { %v8_v0 = vld [vmem:[%s38_s0] sm:$0xff]  ;;  %v9_v1 = vld [vmem:[%s38_s0 + $0x8] sm:$0xff] }
   0x2   :  { %10 = vst [vmem:[%s39_s1] sm:$0xff] %v8_v0  ;;  %11 = vst [vmem:[%s39_s1 + $0x8] sm:$0xff] %v9_v1 }

</bundles_post_ra>
